<compile_context>
chip_gen: v7x
topology: tpu7x:2x2x1
jax: 0.10.0
libtpu: 0.0.40
codegen_flags: <defaults>
</compile_context>

<pallas_src>
import functools

import jax
import jax.numpy as jnp
from jax import lax
from jax.experimental import pallas as pl
from jax.experimental.pallas import tpu as pltpu


# --------------------------------------------------------------------------
# Fused kernel: depthwise 3x3 conv (halo-only-zeroed padded VMEM block) +
# per-channel batch statistics + BN affine, on one channel block.
# --------------------------------------------------------------------------
def _fused_dwconv_bn_kernel(x_ref, w_ref, gamma_ref, beta_ref, o_ref, xp_ref,
                            *, H, W, eps, inv_count):
    N = x_ref.shape[0]
    CB = x_ref.shape[-1]

    # Build the zero-padded block in VMEM: zero only the 1-wide halo
    # (4 slab writes), write the interior exactly once.
    zrow = jnp.zeros((N, 1, W + 2, CB), jnp.float32)
    zcol = jnp.zeros((N, H + 2, 1, CB), jnp.float32)
    xp_ref[:, 0:1, :, :] = zrow
    xp_ref[:, H + 1:H + 2, :, :] = zrow
    xp_ref[:, :, 0:1, :] = zcol
    xp_ref[:, :, W + 1:W + 2, :] = zcol
    xp_ref[:, 1:H + 1, 1:W + 1, :] = x_ref[...].astype(jnp.float32)

    w = w_ref[...].astype(jnp.float32)               # (3, 3, CB)

    # 9-tap depthwise conv, f32 accumulation on the VPU.  The sublane (W)
    # axis is sliced only 3 times (once per kw); kh shifts index the cheap
    # non-tiled H axis of the loaded column.
    acc = jnp.zeros((N, H, W, CB), jnp.float32)
    for kw in range(3):
        col = xp_ref[:, :, kw:kw + W, :]             # (N, H+2, W, CB)
        for kh in range(3):
            acc = acc + col[:, kh:kh + H, :, :] * w[kh, kw, :]

    # Training-mode BatchNorm: biased variance over N*H*W via single-pass
    # sum / sum-of-squares; output as acc*scale + bias (no centered temp).
    s1 = jnp.sum(acc, axis=(0, 1, 2))                # (CB,)
    s2 = jnp.sum(acc * acc, axis=(0, 1, 2))          # (CB,)
    mean = s1 * inv_count
    var = s2 * inv_count - mean * mean
    scale = gamma_ref[0].astype(jnp.float32) * lax.rsqrt(var + eps)
    bias = beta_ref[0].astype(jnp.float32) - mean * scale

    o_ref[...] = (acc * scale + bias).astype(o_ref.dtype)


# --------------------------------------------------------------------------
# Generation-aware VMEM budget / limit and channel-block sizing.
# --------------------------------------------------------------------------
def _vmem_budget_and_limit():
    try:
        cap = getattr(pltpu.get_tpu_info(), "vmem_capacity_bytes", 64 << 20)
    except Exception:  # noqa: BLE001 - fall back to the most conservative part
        cap = 64 << 20
    if cap >= (128 << 20):            # v5e / v6e: 128 MiB physical VMEM
        return 24 << 20, 48 << 20     # (kernel budget, vmem_limit_bytes)
    return 14 << 20, 32 << 20         # v7x: 64 MiB physical, 32 MiB scoped


def _choose_cblk(N, H, W, C, budget_bytes):
    assert C % 128 == 0, "channel count must be a multiple of 128"

    def rup8(v):
        return -(-v // 8) * 8

    # f32 bytes per channel per grid step: double-buffered input and output
    # blocks plus the single padded VMEM scratch (sublane dims pad to 8).
    per_c = 4 * (2 * N * H * rup8(W)             # input  (x2 buffers)
                 + 2 * N * H * rup8(W)           # output (x2 buffers)
                 + N * (H + 2) * rup8(W + 2))    # padded scratch
    cap = max(128, (budget_bytes // per_c) // 128 * 128)

    # ~4 grid steps when C allows: enough for double-buffered DMA/compute
    # overlap on single-TC parts, and 2 steps per core on v7x megacore.
    if C >= 512:
        target = max(128, (C // 4) // 128 * 128)
    elif C >= 256:
        target = C // 2
    else:
        target = C

    cblk = min(C, cap, target)
    cblk = max(128, cblk // 128 * 128)
    while C % cblk != 0:
        cblk -= 128
    return cblk


# --------------------------------------------------------------------------
# Public entry points.
# --------------------------------------------------------------------------
def depthwise_conv_bn_nhwc(x, weight, gamma, beta, eps=1e-5):
    """x: (N, H, W, C); weight: (3, 3, C); gamma/beta: (C,)."""
    N, H, W, C = x.shape
    budget, vmem_limit = _vmem_budget_and_limit()
    cblk = _choose_cblk(N, H, W, C, budget)

    kernel = functools.partial(
        _fused_dwconv_bn_kernel, H=H, W=W, eps=float(eps),
        inv_count=1.0 / float(N * H * W))

    cost = pl.CostEstimate(
        flops=int(18 * N * H * W * C),             # 9 mul + 9 add per element
        transcendentals=int(C),                    # rsqrt per channel
        bytes_accessed=int(2 * 4 * N * H * W * C)  # one read + one write
    )

    return pl.pallas_call(
        kernel,
        out_shape=jax.ShapeDtypeStruct((N, H, W, C), x.dtype),
        grid_spec=pltpu.PrefetchScalarGridSpec(
            num_scalar_prefetch=0,
            grid=(C // cblk,),
            in_specs=[
                pl.BlockSpec((N, H, W, cblk), lambda c: (0, 0, 0, c)),
                pl.BlockSpec((3, 3, cblk), lambda c: (0, 0, c)),
                pl.BlockSpec((1, cblk), lambda c: (0, c)),
                pl.BlockSpec((1, cblk), lambda c: (0, c)),
            ],
            out_specs=pl.BlockSpec((N, H, W, cblk), lambda c: (0, 0, 0, c)),
            scratch_shapes=[
                pltpu.VMEM((N, H + 2, W + 2, cblk), jnp.float32),
            ],
        ),
        compiler_params=pltpu.CompilerParams(
            dimension_semantics=("parallel",),
            vmem_limit_bytes=vmem_limit),
        cost_estimate=cost,
    )(x, weight, gamma.reshape(1, C), beta.reshape(1, C))


def depthwise_conv_bn(x_nchw, weight, gamma, beta, eps=1e-5):
    """NCHW wrapper matching the PyTorch module. weight: (3, 3, C)."""
    # Boundary-only layout conversion (C must sit on the 128-lane axis inside
    # the kernel); call depthwise_conv_bn_nhwc directly in a channels-last
    # graph to avoid these two XLA HBM transposes.
    x = jnp.transpose(x_nchw, (0, 2, 3, 1))
    y = depthwise_conv_bn_nhwc(x, weight, gamma, beta, eps)
    # TODO(synk): BatchNorm running_mean/running_var momentum update is a
    # training-mode side effect that does not affect the returned tensor.
    return jnp.transpose(y, (0, 3, 1, 2))


# --------------------------------------------------------------------------
# Pure-JAX reference (for correctness check only).
# --------------------------------------------------------------------------
def _reference(x_nchw, weight, gamma, beta, eps=1e-5):
    N, C, H, W = x_nchw.shape
    w_oihw = jnp.transpose(weight, (2, 0, 1))[:, None, :, :]
    y = lax.conv_general_dilated(
        x_nchw, w_oihw, window_strides=(1, 1), padding=((1, 1), (1, 1)),
        dimension_numbers=("NCHW", "OIHW", "NCHW"), feature_group_count=C)
    mean = y.mean(axis=(0, 2, 3), keepdims=True)
    var = y.var(axis=(0, 2, 3), keepdims=True)   # biased (training-mode BN)
    return (y - mean) / jnp.sqrt(var + eps) * gamma[None, :, None, None] \
        + beta[None, :, None, None]


if __name__ == "__main__":
    key = jax.random.PRNGKey(0)
    k_x, k_w, k_g, k_b = jax.random.split(key, 4)

    # Small shapes consistent with the module (original: N=1, C=3072, H=W=7).
    N, C, H, W = 2, 256, 7, 7

    x = jax.random.normal(k_x, (N, C, H, W), dtype=jnp.float32)
    weight = jax.random.normal(k_w, (3, 3, C), dtype=jnp.float32) * 0.1
    gamma = 1.0 + 0.1 * jax.random.normal(k_g, (C,), dtype=jnp.float32)
    beta = 0.1 * jax.random.normal(k_b, (C,), dtype=jnp.float32)

    out = depthwise_conv_bn(x, weight, gamma, beta)
    out = jax.block_until_ready(out)

    ref = _reference(x, weight, gamma, beta)
    assert out.shape == (N, C, H, W)
    assert jnp.allclose(out, ref, atol=1e-4, rtol=1e-4), float(
        jnp.max(jnp.abs(out - ref)))

    print("KERNEL_OK")
</pallas_src>

<mosaic_0001>
module attributes {stable_mosaic.version = 11 : i64} {
  func.func @_fused_dwconv_bn_kernel(%arg0: i32, %arg1: memref<2x7x7x128xf32, #tpu.memory_space<vmem>>, %arg2: memref<3x3x128xf32, #tpu.memory_space<vmem>>, %arg3: memref<1x128xf32, #tpu.memory_space<vmem>>, %arg4: memref<1x128xf32, #tpu.memory_space<vmem>>, %arg5: memref<2x7x7x128xf32, #tpu.memory_space<vmem>>, %arg6: memref<2x9x9x128xf32, #tpu.memory_space<vmem>>) attributes {dimension_semantics = [#tpu.dimension_semantics<parallel>], iteration_bounds = array<i64: 2>, scalar_prefetch = 0 : i64, scratch_operands = 1 : i64, tpu.core_type = #tpu.core_type<tc>, window_params = [{transform_indices = @transform_0, window_bounds = array<i64: 2, 7, 7, 128>}, {transform_indices = @transform_1, window_bounds = array<i64: 3, 3, 128>}, {transform_indices = @transform_2, window_bounds = array<i64: 1, 128>}, {transform_indices = @transform_3, window_bounds = array<i64: 1, 128>}, {transform_indices = @transform_4, window_bounds = array<i64: 2, 7, 7, 128>}]} {
    %cst = arith.constant 0.000000e+00 : f32
    %0 = vector.broadcast %cst : f32 to vector<2x1x9x128xf32>
    %cst_0 = arith.constant 0.000000e+00 : f32
    %1 = vector.broadcast %cst_0 : f32 to vector<2x9x1x128xf32>
    %c0 = arith.constant 0 : index
    %c0_1 = arith.constant 0 : index
    %c0_2 = arith.constant 0 : index
    %c0_3 = arith.constant 0 : index
    %2 = vector.load %arg6[%c0, %c0_1, %c0_2, %c0_3] : memref<2x9x9x128xf32, #tpu.memory_space<vmem>>, vector<2x1x9x128xf32>
    tpu.vector_store %arg6[%c0, %c0_1, %c0_2, %c0_3], %0 {strides = array<i32>} : memref<2x9x9x128xf32, #tpu.memory_space<vmem>>, vector<2x1x9x128xf32>,
    %c0_4 = arith.constant 0 : index
    %c8 = arith.constant 8 : index
    %c0_5 = arith.constant 0 : index
    %c0_6 = arith.constant 0 : index
    %3 = vector.load %arg6[%c0_4, %c8, %c0_5, %c0_6] : memref<2x9x9x128xf32, #tpu.memory_space<vmem>>, vector<2x1x9x128xf32>
    tpu.vector_store %arg6[%c0_4, %c8, %c0_5, %c0_6], %0 {strides = array<i32>} : memref<2x9x9x128xf32, #tpu.memory_space<vmem>>, vector<2x1x9x128xf32>,
    %c0_7 = arith.constant 0 : index
    %c0_8 = arith.constant 0 : index
    %c0_9 = arith.constant 0 : index
    %c0_10 = arith.constant 0 : index
    %4 = vector.load %arg6[%c0_7, %c0_8, %c0_9, %c0_10] : memref<2x9x9x128xf32, #tpu.memory_space<vmem>>, vector<2x9x1x128xf32>
    tpu.vector_store %arg6[%c0_7, %c0_8, %c0_9, %c0_10], %1 {strides = array<i32>} : memref<2x9x9x128xf32, #tpu.memory_space<vmem>>, vector<2x9x1x128xf32>,
    %c0_11 = arith.constant 0 : index
    %c0_12 = arith.constant 0 : index
    %c8_13 = arith.constant 8 : index
    %c0_14 = arith.constant 0 : index
    %5 = vector.load %arg6[%c0_11, %c0_12, %c8_13, %c0_14] : memref<2x9x9x128xf32, #tpu.memory_space<vmem>>, vector<2x9x1x128xf32>
    tpu.vector_store %arg6[%c0_11, %c0_12, %c8_13, %c0_14], %1 {strides = array<i32>} : memref<2x9x9x128xf32, #tpu.memory_space<vmem>>, vector<2x9x1x128xf32>,
    %c0_15 = arith.constant 0 : index
    %c0_16 = arith.constant 0 : index
    %c0_17 = arith.constant 0 : index
    %c0_18 = arith.constant 0 : index
    %6 = vector.load %arg1[%c0_15, %c0_16, %c0_17, %c0_18] : memref<2x7x7x128xf32, #tpu.memory_space<vmem>>, vector<2x7x7x128xf32>
    %c0_19 = arith.constant 0 : index
    %c1 = arith.constant 1 : index
    %c1_20 = arith.constant 1 : index
    %c0_21 = arith.constant 0 : index
    %7 = vector.load %arg6[%c0_19, %c1, %c1_20, %c0_21] : memref<2x9x9x128xf32, #tpu.memory_space<vmem>>, vector<2x7x7x128xf32>
    tpu.vector_store %arg6[%c0_19, %c1, %c1_20, %c0_21], %6 {strides = array<i32>} : memref<2x9x9x128xf32, #tpu.memory_space<vmem>>, vector<2x7x7x128xf32>,
    %c0_22 = arith.constant 0 : index
    %c0_23 = arith.constant 0 : index
    %c0_24 = arith.constant 0 : index
    %8 = vector.load %arg2[%c0_22, %c0_23, %c0_24] : memref<3x3x128xf32, #tpu.memory_space<vmem>>, vector<3x3x128xf32>
    %cst_25 = arith.constant 0.000000e+00 : f32
    %9 = vector.broadcast %cst_25 : f32 to vector<2x7x7x128xf32>
    %c0_26 = arith.constant 0 : index
    %c0_27 = arith.constant 0 : index
    %c0_28 = arith.constant 0 : index
    %c0_29 = arith.constant 0 : index
    %10 = vector.load %arg6[%c0_26, %c0_27, %c0_28, %c0_29] : memref<2x9x9x128xf32, #tpu.memory_space<vmem>>, vector<2x9x7x128xf32>
    %11 = vector.extract_strided_slice %10 {offsets = [0, 0, 0, 0], sizes = [2, 7, 7, 128], strides = [1, 1, 1, 1]} : vector<2x9x7x128xf32> to vector<2x7x7x128xf32>
    %12 = vector.extract_strided_slice %8 {offsets = [0, 0, 0], sizes = [1, 1, 128], strides = [1, 1, 1]} : vector<3x3x128xf32> to vector<1x1x128xf32>
    %13 = vector.shape_cast %12 : vector<1x1x128xf32> to vector<128xf32>
    %14 = vector.shape_cast %13 : vector<128xf32> to vector<1x1x1x128xf32>
    %15 = vector.broadcast %14 : vector<1x1x1x128xf32> to vector<2x7x7x128xf32>
    %16 = arith.mulf %11, %15 : vector<2x7x7x128xf32>
    %17 = arith.addf %9, %16 : vector<2x7x7x128xf32>
    %18 = vector.extract_strided_slice %10 {offsets = [0, 1, 0, 0], sizes = [2, 7, 7, 128], strides = [1, 1, 1, 1]} : vector<2x9x7x128xf32> to vector<2x7x7x128xf32>
    %19 = vector.extract_strided_slice %8 {offsets = [1, 0, 0], sizes = [1, 1, 128], strides = [1, 1, 1]} : vector<3x3x128xf32> to vector<1x1x128xf32>
    %20 = vector.shape_cast %19 : vector<1x1x128xf32> to vector<128xf32>
    %21 = vector.shape_cast %20 : vector<128xf32> to vector<1x1x1x128xf32>
    %22 = vector.broadcast %21 : vector<1x1x1x128xf32> to vector<2x7x7x128xf32>
    %23 = arith.mulf %18, %22 : vector<2x7x7x128xf32>
    %24 = arith.addf %17, %23 : vector<2x7x7x128xf32>
    %25 = vector.extract_strided_slice %10 {offsets = [0, 2, 0, 0], sizes = [2, 7, 7, 128], strides = [1, 1, 1, 1]} : vector<2x9x7x128xf32> to vector<2x7x7x128xf32>
    %26 = vector.extract_strided_slice %8 {offsets = [2, 0, 0], sizes = [1, 1, 128], strides = [1, 1, 1]} : vector<3x3x128xf32> to vector<1x1x128xf32>
    %27 = vector.shape_cast %26 : vector<1x1x128xf32> to vector<128xf32>
    %28 = vector.shape_cast %27 : vector<128xf32> to vector<1x1x1x128xf32>
    %29 = vector.broadcast %28 : vector<1x1x1x128xf32> to vector<2x7x7x128xf32>
    %30 = arith.mulf %25, %29 : vector<2x7x7x128xf32>
    %31 = arith.addf %24, %30 : vector<2x7x7x128xf32>
    %c0_30 = arith.constant 0 : index
    %c0_31 = arith.constant 0 : index
    %c1_32 = arith.constant 1 : index
    %c0_33 = arith.constant 0 : index
    %32 = vector.load %arg6[%c0_30, %c0_31, %c1_32, %c0_33] : memref<2x9x9x128xf32, #tpu.memory_space<vmem>>, vector<2x9x7x128xf32>
    %33 = vector.extract_strided_slice %32 {offsets = [0, 0, 0, 0], sizes = [2, 7, 7, 128], strides = [1, 1, 1, 1]} : vector<2x9x7x128xf32> to vector<2x7x7x128xf32>
    %34 = vector.extract_strided_slice %8 {offsets = [0, 1, 0], sizes = [1, 1, 128], strides = [1, 1, 1]} : vector<3x3x128xf32> to vector<1x1x128xf32>
    %35 = vector.shape_cast %34 : vector<1x1x128xf32> to vector<128xf32>
    %36 = vector.shape_cast %35 : vector<128xf32> to vector<1x1x1x128xf32>
    %37 = vector.broadcast %36 : vector<1x1x1x128xf32> to vector<2x7x7x128xf32>
    %38 = arith.mulf %33, %37 : vector<2x7x7x128xf32>
    %39 = arith.addf %31, %38 : vector<2x7x7x128xf32>
    %40 = vector.extract_strided_slice %32 {offsets = [0, 1, 0, 0], sizes = [2, 7, 7, 128], strides = [1, 1, 1, 1]} : vector<2x9x7x128xf32> to vector<2x7x7x128xf32>
    %41 = vector.extract_strided_slice %8 {offsets = [1, 1, 0], sizes = [1, 1, 128], strides = [1, 1, 1]} : vector<3x3x128xf32> to vector<1x1x128xf32>
    %42 = vector.shape_cast %41 : vector<1x1x128xf32> to vector<128xf32>
    %43 = vector.shape_cast %42 : vector<128xf32> to vector<1x1x1x128xf32>
    %44 = vector.broadcast %43 : vector<1x1x1x128xf32> to vector<2x7x7x128xf32>
    %45 = arith.mulf %40, %44 : vector<2x7x7x128xf32>
    %46 = arith.addf %39, %45 : vector<2x7x7x128xf32>
    %47 = vector.extract_strided_slice %32 {offsets = [0, 2, 0, 0], sizes = [2, 7, 7, 128], strides = [1, 1, 1, 1]} : vector<2x9x7x128xf32> to vector<2x7x7x128xf32>
    %48 = vector.extract_strided_slice %8 {offsets = [2, 1, 0], sizes = [1, 1, 128], strides = [1, 1, 1]} : vector<3x3x128xf32> to vector<1x1x128xf32>
    %49 = vector.shape_cast %48 : vector<1x1x128xf32> to vector<128xf32>
    %50 = vector.shape_cast %49 : vector<128xf32> to vector<1x1x1x128xf32>
    %51 = vector.broadcast %50 : vector<1x1x1x128xf32> to vector<2x7x7x128xf32>
    %52 = arith.mulf %47, %51 : vector<2x7x7x128xf32>
    %53 = arith.addf %46, %52 : vector<2x7x7x128xf32>
    %c0_34 = arith.constant 0 : index
    %c0_35 = arith.constant 0 : index
    %c2 = arith.constant 2 : index
    %c0_36 = arith.constant 0 : index
    %54 = vector.load %arg6[%c0_34, %c0_35, %c2, %c0_36] : memref<2x9x9x128xf32, #tpu.memory_space<vmem>>, vector<2x9x7x128xf32>
    %55 = vector.extract_strided_slice %54 {offsets = [0, 0, 0, 0], sizes = [2, 7, 7, 128], strides = [1, 1, 1, 1]} : vector<2x9x7x128xf32> to vector<2x7x7x128xf32>
    %56 = vector.extract_strided_slice %8 {offsets = [0, 2, 0], sizes = [1, 1, 128], strides = [1, 1, 1]} : vector<3x3x128xf32> to vector<1x1x128xf32>
    %57 = vector.shape_cast %56 : vector<1x1x128xf32> to vector<128xf32>
    %58 = vector.shape_cast %57 : vector<128xf32> to vector<1x1x1x128xf32>
    %59 = vector.broadcast %58 : vector<1x1x1x128xf32> to vector<2x7x7x128xf32>
    %60 = arith.mulf %55, %59 : vector<2x7x7x128xf32>
    %61 = arith.addf %53, %60 : vector<2x7x7x128xf32>
    %62 = vector.extract_strided_slice %54 {offsets = [0, 1, 0, 0], sizes = [2, 7, 7, 128], strides = [1, 1, 1, 1]} : vector<2x9x7x128xf32> to vector<2x7x7x128xf32>
    %63 = vector.extract_strided_slice %8 {offsets = [1, 2, 0], sizes = [1, 1, 128], strides = [1, 1, 1]} : vector<3x3x128xf32> to vector<1x1x128xf32>
    %64 = vector.shape_cast %63 : vector<1x1x128xf32> to vector<128xf32>
    %65 = vector.shape_cast %64 : vector<128xf32> to vector<1x1x1x128xf32>
    %66 = vector.broadcast %65 : vector<1x1x1x128xf32> to vector<2x7x7x128xf32>
    %67 = arith.mulf %62, %66 : vector<2x7x7x128xf32>
    %68 = arith.addf %61, %67 : vector<2x7x7x128xf32>
    %69 = vector.extract_strided_slice %54 {offsets = [0, 2, 0, 0], sizes = [2, 7, 7, 128], strides = [1, 1, 1, 1]} : vector<2x9x7x128xf32> to vector<2x7x7x128xf32>
    %70 = vector.extract_strided_slice %8 {offsets = [2, 2, 0], sizes = [1, 1, 128], strides = [1, 1, 1]} : vector<3x3x128xf32> to vector<1x1x128xf32>
    %71 = vector.shape_cast %70 : vector<1x1x128xf32> to vector<128xf32>
    %72 = vector.shape_cast %71 : vector<128xf32> to vector<1x1x1x128xf32>
    %73 = vector.broadcast %72 : vector<1x1x1x128xf32> to vector<2x7x7x128xf32>
    %74 = arith.mulf %69, %73 : vector<2x7x7x128xf32>
    %75 = arith.addf %68, %74 : vector<2x7x7x128xf32>
    %cst_37 = arith.constant dense<0.000000e+00> : vector<128xf32>
    %76 = vector.multi_reduction <add>, %75, %cst_37 [0, 1, 2] : vector<2x7x7x128xf32> to vector<128xf32>
    %77 = arith.mulf %75, %75 : vector<2x7x7x128xf32>
    %cst_38 = arith.constant dense<0.000000e+00> : vector<128xf32>
    %78 = vector.multi_reduction <add>, %77, %cst_38 [0, 1, 2] : vector<2x7x7x128xf32> to vector<128xf32>
    %cst_39 = arith.constant 0.0102040814 : f32
    %79 = vector.broadcast %cst_39 : f32 to vector<128xf32>
    %80 = arith.mulf %76, %79 : vector<128xf32>
    %cst_40 = arith.constant 0.0102040814 : f32
    %81 = vector.broadcast %cst_40 : f32 to vector<128xf32>
    %82 = arith.mulf %78, %81 : vector<128xf32>
    %83 = arith.mulf %80, %80 : vector<128xf32>
    %84 = arith.subf %82, %83 : vector<128xf32>
    %c0_41 = arith.constant 0 : index
    %c0_42 = arith.constant 0 : index
    %85 = vector.load %arg3[%c0_41, %c0_42] : memref<1x128xf32, #tpu.memory_space<vmem>>, vector<1x128xf32>
    %86 = vector.shape_cast %85 : vector<1x128xf32> to vector<128xf32>
    %cst_43 = arith.constant 9.99999974E-6 : f32
    %87 = vector.broadcast %cst_43 : f32 to vector<128xf32>
    %88 = arith.addf %84, %87 : vector<128xf32>
    %89 = math.rsqrt %88 : vector<128xf32>
    %90 = arith.mulf %86, %89 : vector<128xf32>
    %c0_44 = arith.constant 0 : index
    %c0_45 = arith.constant 0 : index
    %91 = vector.load %arg4[%c0_44, %c0_45] : memref<1x128xf32, #tpu.memory_space<vmem>>, vector<1x128xf32>
    %92 = vector.shape_cast %91 : vector<1x128xf32> to vector<128xf32>
    %93 = arith.mulf %80, %90 : vector<128xf32>
    %94 = arith.subf %92, %93 : vector<128xf32>
    %95 = vector.shape_cast %90 : vector<128xf32> to vector<1x1x1x128xf32>
    %96 = vector.broadcast %95 : vector<1x1x1x128xf32> to vector<2x7x7x128xf32>
    %97 = arith.mulf %75, %96 : vector<2x7x7x128xf32>
    %98 = vector.shape_cast %94 : vector<128xf32> to vector<1x1x1x128xf32>
    %99 = vector.broadcast %98 : vector<1x1x1x128xf32> to vector<2x7x7x128xf32>
    %100 = arith.addf %97, %99 : vector<2x7x7x128xf32>
    %c0_46 = arith.constant 0 : index
    %c0_47 = arith.constant 0 : index
    %c0_48 = arith.constant 0 : index
    %c0_49 = arith.constant 0 : index
    %101 = vector.load %arg5[%c0_46, %c0_47, %c0_48, %c0_49] : memref<2x7x7x128xf32, #tpu.memory_space<vmem>>, vector<2x7x7x128xf32>
    tpu.vector_store %arg5[%c0_46, %c0_47, %c0_48, %c0_49], %100 {strides = array<i32>} : memref<2x7x7x128xf32, #tpu.memory_space<vmem>>, vector<2x7x7x128xf32>,
    return
  }
  func.func @transform_0(%arg0: i32) -> (i32, i32, i32, i32) {
    %c0_i32 = arith.constant 0 : i32
    %c0_i32_0 = arith.constant 0 : i32
    %c0_i32_1 = arith.constant 0 : i32
    %c0_i32_2 = arith.constant 0 : i32
    return %c0_i32, %c0_i32_0, %c0_i32_1, %arg0 : i32, i32, i32, i32
  }
  func.func @transform_1(%arg0: i32) -> (i32, i32, i32) {
    %c0_i32 = arith.constant 0 : i32
    %c0_i32_0 = arith.constant 0 : i32
    %c0_i32_1 = arith.constant 0 : i32
    return %c0_i32, %c0_i32_0, %arg0 : i32, i32, i32
  }
  func.func @transform_2(%arg0: i32) -> (i32, i32) {
    %c0_i32 = arith.constant 0 : i32
    %c0_i32_0 = arith.constant 0 : i32
    return %c0_i32, %arg0 : i32, i32
  }
  func.func @transform_3(%arg0: i32) -> (i32, i32) {
    %c0_i32 = arith.constant 0 : i32
    %c0_i32_0 = arith.constant 0 : i32
    return %c0_i32, %arg0 : i32, i32
  }
  func.func @transform_4(%arg0: i32) -> (i32, i32, i32, i32) {
    %c0_i32 = arith.constant 0 : i32
    %c0_i32_0 = arith.constant 0 : i32
    %c0_i32_1 = arith.constant 0 : i32
    %c0_i32_2 = arith.constant 0 : i32
    return %c0_i32, %c0_i32_0, %c0_i32_1, %arg0 : i32, i32, i32, i32
  }
}

</mosaic_0001>

<bundles_post_ra>
// kernel: tpu_custom_call.1
= control target key start
LH: loop header
LB: loop body
LE: loop exit
PB: predicated region body
PF: predicated region fallthrough
CT: control target
= control target key end

     0   :  { %s1216_s15 = smov 0   ;;  %s1218_s16 = smov 0   ;;  %s1785_s0 = inlined_call_operand.vmem [shape: f32[2,7,7,256], index: 0, kind: input, shape index: {}]   ;;  %s1786_s1 = inlined_call_operand.vmem [shape: f32[3,3,256], index: 1, kind: input, shape index: {}]   ;;  %s1787_s2 = inlined_call_operand.vmem [shape: f32[1,256], index: 2, kind: input, shape index: {}]   ;;  %s1788_s3 = inlined_call_operand.vmem [shape: f32[1,256], index: 3, kind: input, shape index: {}]   ;;  %s1789_s4 = inlined_call_operand.vmem [shape: f32[2,7,7,256], index: 4, kind: output, shape index: {}]  }
   0x1   :  { %s1220_s17 = smov 0  }
   0x2 LB: > { %s1232_s18 = sadd.s32 4294967295, %s1188_s17   ;;  %s1235_s19 = sadd.s32 1, %s1188_s17   ;;  %s1188_s17 = sphi %s1220_s17, %s1824_s17   ;;  %s1184_s16 = sphi %s1218_s16, %s1823_s16   ;;  %s1180_s15 = sphi %s1216_s15, %s1822_s15  }
   0x3   : > { %s18_s20 = ssub.s32 %s1188_s17, %s1235_s19  ;;  %s21_s21 = sadd.s32 1, %s1184_s16 }
   0x4   : > { %p19_p0 = scmp.eq.s32.totalorder %s18_s20, 0  ;;  %p28_p1 = scmp.ne.s32.totalorder %s1184_s16, %s1180_s15 }
   0x5   : > { %p29_p2 = scmp.eq.s32.totalorder %s1188_s17, 0  ;;  %p136_p3 = scmp.eq.s32.totalorder %s1232_s18, 1 }
   0x6   : > { %s1245_s22 = scalar_select %p19_p0, %s1184_s16, %s21_s21  }
   0x7   : > { %p1247_p4 = por %p29_p2, %p28_p1  ;;  %p1251_p5 = por %p136_p3, %p28_p1 }
   0x8   : > { %p1128_p6 = scmp.ge.s32.totalorder %s1188_s17, 2 }
   0xa   : > { %158 = sbr.rel (%p1128_p6) target bundleno = 35 (0x23), region = 16 }
  0x11   : > { %161 = sbr.rel (!%p1247_p4) target bundleno = 28 (0x1c), region = 20  ;;  %s163_s25 = sand.u32 (%p1247_p4), 1, %s1184_s16  }
  0x12   : > { %s1129_s26 = sshll.u32 (%p1247_p4), %s1188_s17, 3  ;;  %s1135_s27 = smul.u32 (%p1247_p4), 112, %s163_s25 }
  0x13   : > { %s167_s30 = scalar_lea.vmem (%p1247_p4), %s1785_s0, %s1129_s26 }
  0x14   : > { %v221_v0 = vld [vmem:[%s167_s30] sm:$0xff] (%p1247_p4)  ;;  %v223_v1 = vld [vmem:[%s167_s30 + $0x10] sm:$0xff] (%p1247_p4)  ;;  %s165_s5 = scalar_lea.vmem (%p1247_p4), [#allocation3], %s1135_s27 }
  0x15   : > { %v225_v2 = vld [vmem:[%s167_s30 + $0x20] sm:$0xff] (%p1247_p4)  ;;  %v227_v3 = vld [vmem:[%s167_s30 + $0x30] sm:$0xff] (%p1247_p4)  ;;  %222 = vst [vmem:[%s165_s5] sm:$0xff] (%p1247_p4), %v221_v0  ;;  %224 = vst [vmem:[%s165_s5 + $0x8] sm:$0xff] (%p1247_p4), %v223_v1 }
  0x16   : > { %v229_v4 = vld [vmem:[%s167_s30 + $0x40] sm:$0xff] (%p1247_p4)  ;;  %v231_v5 = vld [vmem:[%s167_s30 + $0x50] sm:$0xff] (%p1247_p4)  ;;  %226 = vst [vmem:[%s165_s5 + $0x10] sm:$0xff] (%p1247_p4), %v225_v2  ;;  %228 = vst [vmem:[%s165_s5 + $0x18] sm:$0xff] (%p1247_p4), %v227_v3 }
  0x17   : > { %230 = vst [vmem:[%s165_s5 + $0x20] sm:$0xff] (%p1247_p4), %v229_v4  ;;  %232 = vst [vmem:[%s165_s5 + $0x28] sm:$0xff] (%p1247_p4), %v231_v5  ;;  %v233_v6 = vld [vmem:[%s167_s30 + $0x60] sm:$0xff] (%p1247_p4)  ;;  %v235_v7 = vld [vmem:[%s167_s30 + $0x70] sm:$0xff] (%p1247_p4) }
  0x18   : > { %v237_v8 = vld [vmem:[%s167_s30 + $0x80] sm:$0xff]  ;;  %234 = vst [vmem:[%s165_s5 + $0x30] sm:$0xff] %v233_v6  ;;  %236 = vst [vmem:[%s165_s5 + $0x38] sm:$0xff] %v235_v7  ;;  %v239_v9 = vld [vmem:[%s167_s30 + $0x90] sm:$0xff] }
  0x19   : > { %238 = vst [vmem:[%s165_s5 + $0x40] sm:$0xff] %v237_v8  ;;  %v241_v10 = vld [vmem:[%s167_s30 + $0xa0] sm:$0xff]  ;;  %v243_v11 = vld [vmem:[%s167_s30 + $0xb0] sm:$0xff]  ;;  %240 = vst [vmem:[%s165_s5 + $0x48] sm:$0xff] %v239_v9 }
  0x1a   : > { %242 = vst [vmem:[%s165_s5 + $0x50] sm:$0xff] %v241_v10  ;;  %244 = vst [vmem:[%s165_s5 + $0x58] sm:$0xff] %v243_v11  ;;  %v245_v12 = vld [vmem:[%s167_s30 + $0xc0] sm:$0xff]  ;;  %v247_v13 = vld [vmem:[%s167_s30 + $0xd0] sm:$0xff] }
  0x1b   : > { %246 = vst [vmem:[%s165_s5 + $0x60] sm:$0xff] %v245_v12  ;;  %248 = vst [vmem:[%s165_s5 + $0x68] sm:$0xff] %v247_v13 }
  0x1c PF: > { %254 = sbr.rel (!%p1247_p4) target bundleno = 35 (0x23), region = 58  ;;  %s256_s6 = sand.u32 (%p1247_p4), 1, %s1184_s16  }
  0x1d   : > { %s1130_s7 = sshll.u32 (%p1247_p4), %s1188_s17, 2  ;;  %s1136_s8 = smul.u32 (%p1247_p4), 12, %s256_s6 }
  0x1e   : > { %s260_s11 = scalar_lea.vmem (%p1247_p4), %s1786_s1, %s1130_s7 }
  0x1f   : > { %v276_v14 = vld [vmem:[%s260_s11] sm:$0xf] (%p1247_p4)  ;;  %v278_v15 = vld [vmem:[%s260_s11 + $0x8] sm:$0xf] (%p1247_p4)  ;;  %v280_v16 = vld [vmem:[%s260_s11 + $0x10] sm:$0xf] (%p1247_p4) }
  0x20   : > { %s258_s12 = scalar_lea.vmem (%p1247_p4), [#allocation4], %s1136_s8 }
  0x21   : > { %277 = vst [vmem:[%s258_s12] sm:$0xf] (%p1247_p4), %v276_v14  ;;  %279 = vst [vmem:[%s258_s12 + $0x4] sm:$0xf] (%p1247_p4), %v278_v15 }
  0x22   : > { %281 = vst [vmem:[%s258_s12 + $0x8] sm:$0xf] (%p1247_p4), %v280_v16 }
  0x23 PF: > { %p1131_p7 = scmp.ge.s32.totalorder %s1188_s17, 1  ;;  %p321_p8 = scmp.lt.s32.totalorder %s1188_s17, 3 }
  0x25   : > { %p322_p9 = pnand %p1131_p7, %p321_p8 }
  0x27   : > { %325 = sbr.rel (%p322_p9) target bundleno = 217 (0xd9), region = 107 }
  0x2e   : > { %s328_s13 = sand.u32 1, %s1180_s15   ;;  %v470_v17 = vlaneseq  ;;  %v1190_v18 = vmov 0.0   ;;  %vm794_vm0 = vcmask 1046528   ;;  %p369_p10 = scmp.lt.s32.totalorder %s1232_s18, 1 }
  0x2f   : > { %375 = vst [vmem:[#allocation2] sm:$0xff] %v1190_v18  ;;  %376 = vst [vmem:[#allocation2 + $0x8] sm:$0x1] %v1190_v18  ;;  %s1275_s14 = smul.u32 112, %s328_s13  ;;  %s1132_s5 = sshll.u32 (%p1251_p5), %s1232_s18, 3 }
  0x30   : > { %377 = vst [vmem:[#allocation2 + $0x90] sm:$0xff] %v1190_v18  ;;  %378 = vst [vmem:[#allocation2 + $0x98] sm:$0x1] %v1190_v18  ;;  %s1138_s17 = smul.u32 12, %s328_s13  ;;  %v471_v19 = vshrl.u32 %v470_v17, 7  ;;  %s948_s8 = scalar_lea.vmem (%p1251_p5), %s1789_s4, %s1132_s5 }
  0x31   : > { %380 = vst [vmem:[#allocation2 + $0x80] sm:$0xff] %v1190_v18  ;;  %381 = vst [vmem:[#allocation2 + $0x88] sm:$0x1] %v1190_v18  ;;  %s1280_s20 = scalar_lea.vmem [#allocation3], %s1275_s14  ;;  %s1739_s30 = scalar_lea.vmem [#allocation5], %s1275_s14 }
  0x32   : > { %382 = vst [vmem:[#allocation2 + $0x110] sm:$0xff] %v1190_v18  ;;  %383 = vst [vmem:[#allocation2 + $0x118] sm:$0x1] %v1190_v18  ;;  %v420_v20 = vld [vmem:[%s1280_s20] sm:$0x7f]  ;;  %s337_s15 = scalar_lea.vmem [#allocation4], %s1138_s17 }
  0x33   : > { %385 = vst [vmem:[#allocation2 + $0x10] sm:$0x1] %v1190_v18  ;;  %386 = vst [vmem:[#allocation2 + $0x20] sm:$0x1] %v1190_v18  ;;  %v421_v21 = vld [vmem:[%s1280_s20 + $0x8] sm:$0x7f] }
  0x34   : > { %387 = vst [vmem:[#allocation2 + $0x30] sm:$0x1] %v1190_v18  ;;  %388 = vst [vmem:[#allocation2 + $0x40] sm:$0x1] %v1190_v18  ;;  %v422_v22 = vld [vmem:[%s1280_s20 + $0x10] sm:$0x7f] }
  0x35   : > { %389 = vst [vmem:[#allocation2 + $0x50] sm:$0x1] %v1190_v18  ;;  %390 = vst [vmem:[#allocation2 + $0x60] sm:$0x1] %v1190_v18  ;;  %v423_v23 = vld [vmem:[%s1280_s20 + $0x18] sm:$0x7f] }
  0x36   : > { %391 = vst [vmem:[#allocation2 + $0x70] sm:$0x1] %v1190_v18  ;;  %394 = vst [vmem:[#allocation2 + $0xa0] sm:$0x1] %v1190_v18  ;;  %v424_v24 = vld [vmem:[%s1280_s20 + $0x20] sm:$0x7f] }
  0x37   : > { %395 = vst [vmem:[#allocation2 + $0xb0] sm:$0x1] %v1190_v18  ;;  %396 = vst [vmem:[#allocation2 + $0xc0] sm:$0x1] %v1190_v18  ;;  %v425_v25 = vld [vmem:[%s1280_s20 + $0x28] sm:$0x7f] }
  0x38   : > { %397 = vst [vmem:[#allocation2 + $0xd0] sm:$0x1] %v1190_v18  ;;  %398 = vst [vmem:[#allocation2 + $0xe0] sm:$0x1] %v1190_v18  ;;  %v426_v26 = vld [vmem:[%s1280_s20 + $0x30] sm:$0x7f] }
  0x39   : > { %399 = vst [vmem:[#allocation2 + $0xf0] sm:$0x1] %v1190_v18  ;;  %400 = vst [vmem:[#allocation2 + $0x100] sm:$0x1] %v1190_v18  ;;  %v449_v27 = vld [vmem:[%s337_s15] sm:$0x7] }
  0x3a   : > { %403 = vst [vmem:[#allocation2 + $0x18] sm:$0x1] %v1190_v18  ;;  %404 = vst [vmem:[#allocation2 + $0x28] sm:$0x1] %v1190_v18  ;;  %v1289_v28 = vsub.s32 0, %v471_v19  ;;  %v586_v38 = vsub.s32 1, %v471_v19 }
  0x3b   : > { %405 = vst [vmem:[#allocation2 + $0x38] sm:$0x1] %v1190_v18  ;;  %406 = vst [vmem:[#allocation2 + $0x48] sm:$0x1] %v1190_v18  ;;  %v427_v29 = vld [vmem:[%s1280_s20 + $0x38] sm:$0x7f] }
  0x3c   : > { %407 = vst [vmem:[#allocation2 + $0x58] sm:$0x1] %v1190_v18  ;;  %408 = vst [vmem:[#allocation2 + $0x68] sm:$0x1] %v1190_v18  ;;  %v428_v30 = vld [vmem:[%s1280_s20 + $0x40] sm:$0x7f]  ;;  %v1299_v37 = vrot.slane %v449_v27, %v1289_v28  ;;  %v1307_v46 = vrot.slane %v449_v27, %v586_v38 }
  0x3d   : > { %409 = vst [vmem:[#allocation2 + $0x78] sm:$0x1] %v1190_v18  ;;  %412 = vst [vmem:[#allocation2 + $0xa8] sm:$0x1] %v1190_v18  ;;  %v429_v31 = vld [vmem:[%s1280_s20 + $0x48] sm:$0x7f] }
  0x3e   : > { %413 = vst [vmem:[#allocation2 + $0xb8] sm:$0x1] %v1190_v18  ;;  %414 = vst [vmem:[#allocation2 + $0xc8] sm:$0x1] %v1190_v18  ;;  %v430_v32 = vld [vmem:[%s1280_s20 + $0x50] sm:$0x7f] }
  0x3f   : > { %415 = vst [vmem:[#allocation2 + $0xd8] sm:$0x1] %v1190_v18  ;;  %416 = vst [vmem:[#allocation2 + $0xe8] sm:$0x1] %v1190_v18  ;;  %v431_v33 = vld [vmem:[%s1280_s20 + $0x58] sm:$0x7f] }
  0x40   : > { %417 = vst [vmem:[#allocation2 + $0xf8] sm:$0x1] %v1190_v18  ;;  %418 = vst [vmem:[#allocation2 + $0x108] sm:$0x1] %v1190_v18  ;;  %v432_v34 = vld [vmem:[%s1280_s20 + $0x60] sm:$0x7f] }
  0x41   : > { %384 = vst [vmem:[#allocation2] sm:$0x1] %v1190_v18  ;;  %392 = vst [vmem:[#allocation2 + $0x80] sm:$0x1] %v1190_v18  ;;  %v450_v35 = vld [vmem:[%s337_s15 + $0x4] sm:$0x7] }
  0x42   : > { %393 = vst [vmem:[#allocation2 + $0x90] sm:$0x1] %v1190_v18  ;;  %401 = vst [vmem:[#allocation2 + $0x110] sm:$0x1] %v1190_v18  ;;  %v433_v36 = vld [vmem:[%s1280_s20 + $0x68] sm:$0x7f]  ;;  %v1302_v41 = vrot.slane %v450_v35, %v1289_v28  ;;  %v1313_v51 = vrot.slane %v450_v35, %v586_v38 }
  0x43   : > { %402 = vst [vmem:[#allocation2 + $0x8] sm:$0x1] %v1190_v18  ;;  %410 = vst [vmem:[#allocation2 + $0x88] sm:$0x1] %v1190_v18  ;;  %v700_v40 = vsub.s32 2, %v471_v19  ;;  %s370_s21 = scalar_select %p369_p10, %s1232_s18, 1 }
  0x44   : > { %411 = vst [vmem:[#allocation2 + $0x98] sm:$0x1] %v1190_v18  ;;  %419 = vst [vmem:[#allocation2 + $0x118] sm:$0x1] %v1190_v18  ;;  %v451_v42 = vld [vmem:[%s337_s15 + $0x8] sm:$0x7] }
  0x45   : > { %435 = vst [vmem:[#allocation2 + $0x11] sm:$0x7f] %v420_v20  ;;  %436 = vst [vmem:[#allocation2 + $0x21] sm:$0x7f] %v421_v21  ;;  %v575_v43 = vld [vmem:[#allocation2 + $0x91] sm:$0x7f]  ;;  %v1309_v47 = vrot.slane %v449_v27, %v700_v40  ;;  %v1316_v53 = vrot.slane %v451_v42, %v1289_v28  ;;  %v1323_v62 = vrot.slane %v450_v35, %v700_v40  ;;  %s371_s26 = scalar_lea.vmem %s1787_s2, %s370_s21  ;;  %s374_s29 = scalar_lea.vmem %s1788_s3, %s370_s21 }
  0x46   : > { %437 = vst [vmem:[#allocation2 + $0x31] sm:$0x7f] %v422_v22  ;;  %438 = vst [vmem:[#allocation2 + $0x41] sm:$0x7f] %v423_v23  ;;  %v574_v57 = vld [vmem:[#allocation2 + $0x81] sm:$0x7f]  ;;  %v595_v58 = vmul.f32 %v1307_v46, %v575_v43  ;;  %v1325_v63 = vrot.slane %v451_v42, %v586_v38  ;;  %v1337_v10 = vrot.slane %v451_v42, %v700_v40 }
  0x47   : > { %439 = vst [vmem:[#allocation2 + $0x51] sm:$0x7f] %v424_v24  ;;  %440 = vst [vmem:[#allocation2 + $0x61] sm:$0x7f] %v425_v25  ;;  %v583_v5 = vld [vmem:[#allocation2 + $0x111] sm:$0x7f] }
  0x48   : > { %441 = vst [vmem:[#allocation2 + $0x71] sm:$0x7f] %v426_v26  ;;  %1794 = vst [vmem:[#allocation6_spill] sm:$0xff] %v1289_v28  ;;  %v460_v50 = vld [vmem:[#allocation2 + $0x80] sm:$0x7f]  ;;  %v1346_v13 = vmul.f32 %v1325_v63, %v574_v57  ;;  %v1359_v26 = vmul.f32 %v1325_v63, %v583_v5 }
  0x49   : > { %442 = vst [vmem:[#allocation2 + $0xa1] sm:$0x7f] %v427_v29  ;;  %443 = vst [vmem:[#allocation2 + $0xb1] sm:$0x7f] %v428_v30  ;;  %v461_v39 = vld [vmem:[#allocation2 + $0x90] sm:$0x7f]  ;;  %v544_v9 = vmul.f32 %v1316_v53, %v460_v50 }
  0x4a   : > { %444 = vst [vmem:[#allocation2 + $0xc1] sm:$0x7f] %v429_v31  ;;  %445 = vst [vmem:[#allocation2 + $0xd1] sm:$0x7f] %v430_v32  ;;  %v481_v44 = vmul.f32 %v1299_v37, %v461_v39  ;;  %v469_v59 = vld [vmem:[#allocation2 + $0x110] sm:$0x7f] }
  0x4b   : > { %446 = vst [vmem:[#allocation2 + $0xe1] sm:$0x7f] %v431_v33  ;;  %447 = vst [vmem:[#allocation2 + $0xf1] sm:$0x7f] %v432_v34  ;;  %v689_v60 = vld [vmem:[#allocation2 + $0x92] sm:$0x7f]  ;;  %v1343_v12 = vmul.f32 %v1316_v53, %v469_v59 }
  0x4c   : > { %448 = vst [vmem:[#allocation2 + $0x101] sm:$0x7f] %v433_v36  ;;  %v688_v6 = vld [vmem:[#allocation2 + $0x82] sm:$0x7f]  ;;  %v1340_v11 = vmul.f32 %v1309_v47, %v689_v60  ;;  %1795 = vst [vmem:[#allocation7_spill] sm:$0xff] %v1359_v26 }
  0x4d   : > { %v452_v16 = vld [vmem:[#allocation2] sm:$0x7f]  ;;  %v1362_v29 = vmul.f32 %v1337_v10, %v688_v6  ;;  %v453_v33 = vld [vmem:[#allocation2 + $0x10] sm:$0x7f] }
  0x4e   : > { %v1305_v45 = vld [vmem:[#allocation2 + $0x50] sm:$0x7f]  ;;  %v1311_v48 = vld [vmem:[#allocation2 + $0x60] sm:$0x7f]  ;;  %v1368_v35 = vmul.f32 %v1299_v37, %v452_v16  ;;  %v1391_v57 = vmul.f32 %v1299_v37, %v453_v33  ;;  %v506_v5 = vmul.f32 %v1302_v41, %v453_v33 }
  0x4f   : > { %v459_v52 = vld [vmem:[#allocation2 + $0x70] sm:$0x7f]  ;;  %v479_v61 = vmul.f32 %v1299_v37, %v1305_v45  ;;  %v511_v0 = vmul.f32 %v1302_v41, %v1311_v48  ;;  %v480_v7 = vmul.f32 %v1299_v37, %v1311_v48  ;;  %v1350_v18 = vld [vmem:[#allocation2 + $0x61] sm:$0x7f]  ;;  %1796 = vst [vmem:[#allocation8_spill] sm:$0xff] %v1362_v29 }
  0x50   : > { %v462_v49 = vld [vmem:[#allocation2 + $0xa0] sm:$0x7f]  ;;  %v463_v56 = vld [vmem:[#allocation2 + $0xb0] sm:$0x7f]  ;;  %v512_v8 = vmul.f32 %v1302_v41, %v459_v52  ;;  %v543_v25 = vmul.f32 %v1316_v53, %v459_v52  ;;  %v594_v38 = vmul.f32 %v1307_v46, %v1350_v18  ;;  %v1376_v39 = vmul.f32 %v1313_v51, %v1350_v18 }
  0x51   : > { %v482_v54 = vmul.f32 %v1299_v37, %v462_v49  ;;  %v513_v55 = vmul.f32 %v1302_v41, %v462_v49  ;;  %v514_v2 = vmul.f32 %v1302_v41, %v463_v56  ;;  %v545_v3 = vmul.f32 %v1316_v53, %v463_v56  ;;  %v1331_v4 = vld [vmem:[#allocation2 + $0xc0] sm:$0x7f]  ;;  %v1348_v17 = vld [vmem:[#allocation2 + $0x51] sm:$0x7f] }
  0x52   : > { %v576_v14 = vld [vmem:[#allocation2 + $0xa1] sm:$0x7f]  ;;  %v573_v19 = vld [vmem:[#allocation2 + $0x71] sm:$0x7f]  ;;  %v483_v20 = vmul.f32 %v1299_v37, %v463_v56  ;;  %v515_v22 = vmul.f32 %v1302_v41, %v1331_v4  ;;  %v546_v23 = vmul.f32 %v1316_v53, %v1331_v4  ;;  %v525_v24 = vadd.f32 %v511_v0, %v479_v61 }
  0x53   : > { %v527_v1 = vadd.f32 %v513_v55, %v481_v44  ;;  %v528_v15 = vadd.f32 %v514_v2, %v482_v54  ;;  %v465_v27 = vld [vmem:[#allocation2 + $0xd0] sm:$0x7f]  ;;  %v526_v30 = vadd.f32 %v512_v8, %v480_v7  ;;  %v596_v31 = vmul.f32 %v1307_v46, %v576_v14  ;;  %v1365_v34 = vld [vmem:[#allocation2 + $0x20] sm:$0x7f] }
  0x54   : > { %v593_v36 = vmul.f32 %v1307_v46, %v1348_v17  ;;  %v1379_v40 = vmul.f32 %v1313_v51, %v573_v19  ;;  %v577_v42 = vld [vmem:[#allocation2 + $0xb1] sm:$0x7f]  ;;  %v627_v44 = vmul.f32 %v1313_v51, %v576_v14  ;;  %v529_v50 = vadd.f32 %v515_v22, %v483_v20  ;;  %v1385_v54 = vld [vmem:[#allocation2 + $0x40] sm:$0x7f] }
  0x55   : > { %v559_v21 = vadd.f32 %v545_v3, %v527_v1  ;;  %v560_v32 = vadd.f32 %v546_v23, %v528_v15  ;;  %v1381_v43 = vld [vmem:[#allocation2 + $0x30] sm:$0x7f]  ;;  %v547_v52 = vmul.f32 %v1316_v53, %v465_v27  ;;  %v557_v55 = vadd.f32 %v543_v25, %v525_v24  ;;  %v690_v61 = vld [vmem:[#allocation2 + $0xa2] sm:$0x7f] }
  0x56   : > { %v1388_v56 = vmul.f32 %v1325_v63, %v573_v19  ;;  %v1395_v59 = vmul.f32 %v1299_v37, %v1365_v34  ;;  %v558_v60 = vadd.f32 %v544_v9, %v526_v30  ;;  %v1400_v1 = vmul.f32 %v1299_v37, %v1381_v43  ;;  %v578_v2 = vld [vmem:[#allocation2 + $0xc1] sm:$0x7f]  ;;  %v1413_v15 = vld [vmem:[#allocation2 + $0xb2] sm:$0x7f] }
  0x57   : > { %v609_v49 = vadd.f32 %v595_v58, %v559_v21  ;;  %v628_v58 = vmul.f32 %v1313_v51, %v577_v42  ;;  %v610_v0 = vadd.f32 %v596_v31, %v560_v32  ;;  %v1404_v3 = vmul.f32 %v1299_v37, %v1385_v54  ;;  %v692_v22 = vld [vmem:[#allocation2 + $0xc2] sm:$0x7f] }
  0x58   : > { %v507_v6 = vmul.f32 %v1302_v41, %v1365_v34  ;;  %v508_v7 = vmul.f32 %v1302_v41, %v1381_v43  ;;  %v597_v8 = vmul.f32 %v1307_v46, %v577_v42  ;;  %v659_v14 = vmul.f32 %v1325_v63, %v577_v42  ;;  %v466_v32 = vld [vmem:[#allocation2 + $0xe0] sm:$0x7f]  ;;  %v579_v42 = vld [vmem:[#allocation2 + $0xd1] sm:$0x7f] }
  0x59   : > { %v641_v9 = vadd.f32 %v627_v44, %v609_v49  ;;  %v561_v16 = vadd.f32 %v547_v52, %v529_v50  ;;  %v1415_v19 = vadd.f32 %v593_v36, %v557_v55  ;;  %v710_v20 = vmul.f32 %v1309_v47, %v690_v61  ;;  %v693_v55 = vld [vmem:[#allocation2 + $0xd2] sm:$0x7f]  ;;  %v580_v28 = vld [vmem:[#allocation2 + $0xe1] sm:$0x7f] }
  0x5a   : > { %v484_v21 = vmul.f32 %v1299_v37, %v1331_v4  ;;  %v516_v23 = vmul.f32 %v1302_v41, %v465_v27  ;;  %v1421_v24 = vadd.f32 %v594_v38, %v558_v60  ;;  %v1424_v25 = vmul.f32 %v1323_v62, %v690_v61 }
  0x5b   : > { %v642_v30 = vadd.f32 %v628_v58, %v610_v0  ;;  %v660_v31 = vmul.f32 %v1325_v63, %v578_v2  ;;  %v1429_v33 = vmul.f32 %v1309_v47, %v1413_v15  ;;  %v1433_v36 = vmul.f32 %v1323_v62, %v1413_v15 }
  0x5c   : > { %v598_v4 = vmul.f32 %v1307_v46, %v578_v2  ;;  %v629_v38 = vmul.f32 %v1313_v51, %v578_v2  ;;  %v673_v44 = vadd.f32 %v659_v14, %v641_v9  ;;  %v1438_v49 = vmul.f32 %v1309_v47, %v692_v22 }
  0x5d   : > { %1797 = vst [vmem:[#allocation9_spill] sm:$0xff] %v1433_v36  ;;  %v1441_v50 = vmul.f32 %v1323_v62, %v692_v22  ;;  %v611_v52 = vadd.f32 %v597_v8, %v561_v16  ;;  %v1444_v60 = vmul.f32 %v1337_v10, %v692_v22  ;;  %v485_v61 = vmul.f32 %v1299_v37, %v465_v27 }
  0x5e   : > { %1798 = vst [vmem:[#allocation10_spill] sm:$0xff] %v1438_v49  ;;  %v530_v58 = vadd.f32 %v516_v23, %v484_v21  ;;  %v548_v0 = vmul.f32 %v1316_v53, %v466_v32  ;;  %v674_v2 = vadd.f32 %v660_v31, %v642_v30  ;;  %v1449_v9 = vmul.f32 %v1307_v46, %v579_v42  ;;  %v694_v21 = vld [vmem:[#allocation2 + $0xe2] sm:$0x7f] }
  0x5f   : > { %1799 = vst [vmem:[#allocation11_spill] sm:$0xff] %v1444_v60  ;;  %v630_v14 = vmul.f32 %v1313_v51, %v579_v42  ;;  %v517_v26 = vmul.f32 %v1302_v41, %v466_v32  ;;  %v661_v8 = vmul.f32 %v1325_v63, %v579_v42  ;;  %v1455_v16 = vmul.f32 %v1309_v47, %v693_v55 }
  0x60   : > { %v1458_v22 = vmul.f32 %v1323_v62, %v693_v55  ;;  %v1461_v27 = vmul.f32 %v1337_v10, %v693_v55  ;;  %v1464_v23 = vadd.f32 %v1340_v11, %v673_v44  ;;  %v643_v30 = vadd.f32 %v629_v38, %v611_v52 }
  0x61   : > { %1800 = vst [vmem:[#allocation12_spill] sm:$0xff] %v1455_v16  ;;  %v486_v31 = vmul.f32 %v1299_v37, %v466_v32  ;;  %v1468_v60 = vmul.f32 %v1307_v46, %v580_v28  ;;  %v562_v42 = vadd.f32 %v548_v0, %v530_v58  ;;  %v1471_v29 = vmul.f32 %v1313_v51, %v580_v28 }
  0x62   : > { %1801 = vst [vmem:[#allocation13_spill] sm:$0xff] %v1458_v22  ;;  %1802 = vst [vmem:[#allocation14_spill] sm:$0xff] %v1461_v27  ;;  %v1474_v16 = vmul.f32 %v1325_v63, %v580_v28  ;;  %v467_v22 = vld [vmem:[#allocation2 + $0xf0] sm:$0x7f]  ;;  %v509_v55 = vmul.f32 %v1302_v41, %v1385_v54  ;;  %v1478_v27 = vadd.f32 %v710_v20, %v674_v2 }
  0x63   : > { %v531_v11 = vadd.f32 %v517_v26, %v485_v61  ;;  %v1481_v38 = vmul.f32 %v1309_v47, %v694_v21  ;;  %v510_v32 = vmul.f32 %v1302_v41, %v1305_v45  ;;  %v1486_v44 = vmul.f32 %v1323_v62, %v694_v21  ;;  %v581_v26 = vld [vmem:[#allocation2 + $0xf1] sm:$0x7f] }
  0x64   : > { %1803 = vst [vmem:[#allocation15_spill] sm:$0xff] %v1478_v27  ;;  %v1489_v52 = vmul.f32 %v1337_v10, %v694_v21  ;;  %v520_v28 = vadd.f32 %v506_v5, %v1368_v35  ;;  %v521_v58 = vadd.f32 %v507_v6, %v1391_v57  ;;  %v675_v0 = vadd.f32 %v661_v8, %v643_v30  ;;  %v568_v8 = vld [vmem:[#allocation2 + $0x21] sm:$0x7f]  ;;  %v569_v30 = vld [vmem:[#allocation2 + $0x31] sm:$0x7f] }
  0x65   : > { %1804 = vst [vmem:[#allocation16_spill] sm:$0xff] %v1481_v38  ;;  %1805 = vst [vmem:[#allocation17_spill] sm:$0xff] %v1486_v44  ;;  %v1494_v20 = vmul.f32 %v1299_v37, %v467_v22  ;;  %v522_v61 = vadd.f32 %v508_v7, %v1395_v59  ;;  %v523_v2 = vadd.f32 %v509_v55, %v1400_v1  ;;  %v695_v37 = vld [vmem:[#allocation2 + $0xf2] sm:$0x7f]  ;;  %v566_v1 = vld [vmem:[#allocation2 + $0x1] sm:$0x7f] }
  0x66   : > { %1806 = vst [vmem:[#allocation18_spill] sm:$0xff] %v1489_v52  ;;  %v612_v38 = vadd.f32 %v598_v4, %v562_v42  ;;  %v524_v36 = vadd.f32 %v510_v32, %v1404_v3  ;;  %v538_v21 = vmul.f32 %v1316_v53, %v1365_v34  ;;  %v539_v35 = vmul.f32 %v1316_v53, %v1381_v43  ;;  %v567_v7 = vld [vmem:[#allocation2 + $0x11] sm:$0x7f]  ;;  %v570_v55 = vld [vmem:[#allocation2 + $0x41] sm:$0x7f] }
  0x67   : > { %v518_v57 = vmul.f32 %v1302_v41, %v467_v22  ;;  %v549_v5 = vmul.f32 %v1316_v53, %v467_v22  ;;  %v540_v6 = vmul.f32 %v1316_v53, %v1385_v54  ;;  %v541_v59 = vmul.f32 %v1316_v53, %v1305_v45  ;;  %v468_v27 = vld [vmem:[#allocation2 + $0x100] sm:$0x7f] }
  0x68   : > { %v1510_v3 = vmul.f32 %v1307_v46, %v581_v26  ;;  %v542_v34 = vmul.f32 %v1316_v53, %v1311_v48  ;;  %v552_v43 = vadd.f32 %v538_v21, %v520_v28  ;;  %v553_v4 = vadd.f32 %v539_v35, %v521_v58 }
  0x69   : > { %v1515_v22 = vmul.f32 %v1313_v51, %v581_v26  ;;  %v1518_v54 = vmul.f32 %v1325_v63, %v581_v26  ;;  %v554_v42 = vadd.f32 %v540_v6, %v522_v61  ;;  %v555_v45 = vadd.f32 %v541_v59, %v523_v2 }
  0x6a   : > { %v1521_v32 = vmul.f32 %v1309_v47, %v695_v37  ;;  %v556_v52 = vadd.f32 %v542_v34, %v524_v36  ;;  %v588_v44 = vmul.f32 %v1307_v46, %v566_v1  ;;  %v589_v48 = vmul.f32 %v1307_v46, %v567_v7 }
  0x6b   : > { %v725_v28 = vadd.f32 %v1429_v33, %v675_v0  ;;  %v644_v58 = vadd.f32 %v630_v14, %v612_v38  ;;  %v590_v21 = vmul.f32 %v1307_v46, %v568_v8  ;;  %v591_v35 = vmul.f32 %v1307_v46, %v569_v30 }
  0x6c   : > { %1807 = vst [vmem:[#allocation19_spill] sm:$0xff] %v1521_v32  ;;  %v532_v26 = vadd.f32 %v518_v57, %v486_v31  ;;  %v592_v61 = vmul.f32 %v1307_v46, %v570_v55  ;;  %v602_v2 = vadd.f32 %v588_v44, %v552_v43  ;;  %v603_v6 = vadd.f32 %v589_v48, %v553_v4 }
  0x6d   : > { %v563_v59 = vadd.f32 %v549_v5, %v531_v11  ;;  %v604_v32 = vadd.f32 %v590_v21, %v554_v42  ;;  %v605_v36 = vadd.f32 %v591_v35, %v555_v45  ;;  %v620_v1 = vmul.f32 %v1313_v51, %v567_v7  ;;  %v680_v42 = vld [vmem:[#allocation2 + $0x2] sm:$0x7f] }
  0x6e   : > { %v606_v34 = vadd.f32 %v592_v61, %v556_v52  ;;  %v621_v49 = vmul.f32 %v1313_v51, %v568_v8  ;;  %v622_v33 = vmul.f32 %v1313_v51, %v569_v30  ;;  %v623_v14 = vmul.f32 %v1313_v51, %v570_v55  ;;  %v684_v35 = vld [vmem:[#allocation2 + $0x42] sm:$0x7f] }
  0x6f   : > { %v1534_v38 = vmul.f32 %v1323_v62, %v695_v37  ;;  %v1537_v46 = vmul.f32 %v1337_v10, %v695_v37  ;;  %v624_v31 = vmul.f32 %v1313_v51, %v1348_v17  ;;  %v634_v11 = vadd.f32 %v620_v1, %v602_v2 }
  0x70   : > { %v519_v44 = vmul.f32 %v1302_v41, %v468_v27  ;;  %v635_v0 = vadd.f32 %v621_v49, %v603_v6  ;;  %v636_v52 = vadd.f32 %v622_v33, %v604_v32  ;;  %v637_v57 = vadd.f32 %v623_v14, %v605_v36  ;;  %v681_v49 = vld [vmem:[#allocation2 + $0x12] sm:$0x7f]  ;;  %v682_v32 = vld [vmem:[#allocation2 + $0x22] sm:$0x7f] }
  0x71   : > { %v1543_v5 = vadd.f32 %v1441_v50, %v725_v28  ;;  %v550_v7 = vmul.f32 %v1316_v53, %v468_v27  ;;  %v638_v43 = vadd.f32 %v624_v31, %v606_v34  ;;  %v652_v4 = vmul.f32 %v1325_v63, %v568_v8 }
  0x72   : > { %v653_v37 = vmul.f32 %v1325_v63, %v569_v30  ;;  %v654_v45 = vmul.f32 %v1325_v63, %v570_v55  ;;  %v655_v48 = vmul.f32 %v1325_v63, %v1348_v17  ;;  %v656_v41 = vmul.f32 %v1325_v63, %v1350_v18  ;;  %v683_v30 = vld [vmem:[#allocation2 + $0x32] sm:$0x7f] }
  0x73   : > { %v1554_v50 = vadd.f32 %v1474_v16, %v644_v58  ;;  %v613_v53 = vadd.f32 %v1449_v9, %v563_v59  ;;  %v639_v27 = vadd.f32 %v1376_v39, %v1415_v19  ;;  %v666_v8 = vadd.f32 %v652_v4, %v634_v11  ;;  %v685_v19 = vld [vmem:[#allocation2 + $0x52] sm:$0x7f] }
  0x74   : > { %v667_v28 = vadd.f32 %v653_v37, %v635_v0  ;;  %v668_v55 = vadd.f32 %v654_v45, %v636_v52  ;;  %v669_v21 = vadd.f32 %v655_v48, %v637_v57  ;;  %v702_v17 = vmul.f32 %v1309_v47, %v680_v42  ;;  %v582_v37 = vld [vmem:[#allocation2 + $0x101] sm:$0x7f]  ;;  %v687_v45 = vld [vmem:[#allocation2 + $0x72] sm:$0x7f] }
  0x75   : > { %v640_v18 = vadd.f32 %v1379_v40, %v1421_v24  ;;  %v670_v61 = vadd.f32 %v656_v41, %v638_v43  ;;  %v703_v16 = vmul.f32 %v1309_v47, %v681_v49  ;;  %v704_v58 = vmul.f32 %v1309_v47, %v682_v32  ;;  %v686_v40 = vld [vmem:[#allocation2 + $0x62] sm:$0x7f] }
  0x76   : > { %v533_v9 = vadd.f32 %v519_v44, %v1494_v20  ;;  %v564_v39 = vadd.f32 %v550_v7, %v532_v26  ;;  %v705_v2 = vmul.f32 %v1309_v47, %v683_v30  ;;  %v716_v6 = vadd.f32 %v702_v17, %v666_v8 }
  0x77   : > { %v671_v59 = vadd.f32 %v1388_v56, %v639_v27  ;;  %v706_v36 = vmul.f32 %v1309_v47, %v684_v35  ;;  %v717_v1 = vadd.f32 %v703_v16, %v667_v28  ;;  %v718_v34 = vadd.f32 %v704_v58, %v668_v55 }
  0x78   : > { %v719_v24 = vadd.f32 %v705_v2, %v669_v21  ;;  %v734_v33 = vmul.f32 %v1323_v62, %v681_v49  ;;  %v735_v14 = vmul.f32 %v1323_v62, %v682_v32  ;;  %v736_v31 = vmul.f32 %v1323_v62, %v683_v30 }
  0x79   : > { %v645_v20 = vadd.f32 %v1471_v29, %v613_v53  ;;  %v672_v26 = vadd.f32 %v1346_v13, %v640_v18  ;;  %v707_v11 = vmul.f32 %v1309_v47, %v685_v19  ;;  %v720_v44 = vadd.f32 %v706_v36, %v670_v61 }
  0x7a   : > { %v737_v56 = vmul.f32 %v1323_v62, %v684_v35  ;;  %v748_v0 = vadd.f32 %v734_v33, %v716_v6  ;;  %v749_v52 = vadd.f32 %v735_v14, %v717_v1  ;;  %v750_v57 = vadd.f32 %v736_v31, %v718_v34  ;;  %v1810_v31 = vld [vmem:[#allocation9_spill] sm:$0xff] }
  0x7b   : > { %v565_v7 = vadd.f32 %v1343_v12, %v533_v9  ;;  %v708_v43 = vmul.f32 %v1309_v47, %v686_v40  ;;  %v721_v4 = vadd.f32 %v707_v11, %v671_v59  ;;  %v738_v42 = vmul.f32 %v1323_v62, %v685_v19  ;;  %v696_v9 = vld [vmem:[#allocation2 + $0x102] sm:$0x7f] }
  0x7c   : > { %v751_v29 = vadd.f32 %v737_v56, %v719_v24  ;;  %v766_v13 = vmul.f32 %v1337_v10, %v682_v32  ;;  %v767_v48 = vmul.f32 %v1337_v10, %v683_v30  ;;  %v768_v41 = vmul.f32 %v1337_v10, %v684_v35  ;;  %v1808_v24 = vld [vmem:[#allocation10_spill] sm:$0xff] }
  0x7d   : > { %v614_v49 = vadd.f32 %v1468_v60, %v564_v39  ;;  %v722_v53 = vadd.f32 %v708_v43, %v672_v26  ;;  %v739_v27 = vmul.f32 %v1323_v62, %v686_v40  ;;  %v752_v12 = vadd.f32 %v738_v42, %v720_v44  ;;  %v1811_v26 = vld [vmem:[#allocation8_spill] sm:$0xff] }
  0x7e   : > { %v769_v47 = vmul.f32 %v1337_v10, %v685_v19  ;;  %v1584_v8 = vadd.f32 %v766_v13, %v748_v0  ;;  %v1586_v28 = vadd.f32 %v767_v48, %v749_v52  ;;  %v1588_v55 = vadd.f32 %v768_v41, %v750_v57  ;;  %v1812_v0 = vld [vmem:[#allocation12_spill] sm:$0xff]  ;;  %v1813_v57 = vld [vmem:[#allocation7_spill] sm:$0xff] }
  0x7f   : > { %v633_v32 = vmul.f32 %v1313_v51, %v582_v37  ;;  %v615_v30 = vadd.f32 %v1510_v3, %v565_v7  ;;  %v740_v21 = vmul.f32 %v1323_v62, %v687_v45  ;;  %v753_v35 = vadd.f32 %v739_v27, %v721_v4  ;;  %v1815_v13 = vld [vmem:[#allocation16_spill] sm:$0xff] }
  0x80   : > { %v770_v60 = vmul.f32 %v1337_v10, %v686_v40  ;;  %v1594_v17 = vadd.f32 %v769_v47, %v751_v29  ;;  %v795_v18 = vsel %vm794_vm0, %v1584_v8, 0.0  ;;  %v796_v61 = vsel %vm794_vm0, %v1586_v28, 0.0 }
  0x81   : > { %v677_v16 = vadd.f32 %v1518_v54, %v645_v20  ;;  %v646_v58 = vadd.f32 %v1515_v22, %v614_v49  ;;  %v664_v51 = vmul.f32 %v1325_v63, %v582_v37  ;;  %v797_v3 = vadd.f32 %v796_v61, %v795_v18 }
  0x82   : > { %v754_v39 = vadd.f32 %v740_v21, %v722_v53  ;;  %v771_v19 = vmul.f32 %v1337_v10, %v687_v45  ;;  %v1604_v2 = vadd.f32 %v770_v60, %v752_v12  ;;  %v798_v6 = vsel %vm794_vm0, %v1588_v55, 0.0  ;;  %v1814_v45 = vld [vmem:[#allocation13_spill] sm:$0xff]  ;;  %v1816_v53 = vld [vmem:[#allocation11_spill] sm:$0xff] }
  0x83   : > { %v647_v59 = vadd.f32 %v633_v32, %v615_v30  ;;  %v755_v36 = vadd.f32 %v1424_v25, %v1464_v23  ;;  %v773_v54 = vmul.f32 %v1337_v10, %v1413_v15  ;;  %v799_v22 = vadd.f32 %v798_v6, %v797_v3  ;;  %v1809_v15 = vld [vmem:[#allocation15_spill] sm:$0xff]  ;;  %v1817_v30 = vld [vmem:[#allocation17_spill] sm:$0xff]  ;;  %v1820_v6 = vld [vmem:[#allocation18_spill] sm:$0xff] }
  0x84   : > { %v1612_v1 = vadd.f32 %v771_v19, %v753_v35  ;;  %v800_v63 = vsel %vm794_vm0, %v1594_v17, 0.0  ;;  %v828_v34 = vmul.f32 %v1584_v8, %v1584_v8  ;;  %v829_v40 = vmul.f32 %v1586_v28, %v1586_v28  ;;  %v1818_v35 = vld [vmem:[#allocation19_spill] sm:$0xff] }
  0x85   : > { %v726_v33 = vadd.f32 %v1808_v24, %v1554_v50  ;;  %v678_v14 = vadd.f32 %v664_v51, %v646_v58  ;;  %v747_v25 = vmul.f32 %v1323_v62, %v696_v9  ;;  %v801_v23 = vadd.f32 %v800_v63, %v799_v22  ;;  %v1819_v58 = vld [vmem:[#allocation14_spill] sm:$0xff] }
  0x86   : > { %v756_v20 = vadd.f32 %v1810_v31, %v1809_v15  ;;  %v1626_v11 = vadd.f32 %v1811_v26, %v754_v39  ;;  %v802_v44 = vsel %vm794_vm0, %v1604_v2, 0.0  ;;  %v830_v56 = vmul.f32 %v1588_v55, %v1588_v55 }
  0x87   : > { %v727_v52 = vadd.f32 %v1812_v0, %v677_v16  ;;  %v679_v50 = vadd.f32 %v1813_v57, %v647_v59  ;;  %v1634_v7 = vadd.f32 %v773_v54, %v755_v36  ;;  %v803_v62 = vadd.f32 %v802_v44, %v801_v23  ;;  %v697_v16 = vld [vmem:[#allocation2 + $0x112] sm:$0x7f] }
  0x88   : > { %v804_v43 = vsel %vm794_vm0, %v1612_v1, 0.0  ;;  %v831_v4 = vmul.f32 %v1594_v17, %v1594_v17  ;;  %v842_v42 = vsel %vm794_vm0, %v828_v34, 0.0  ;;  %v843_v37 = vsel %vm794_vm0, %v829_v40, 0.0 }
  0x89   : > { %v758_v29 = vadd.f32 %v1814_v45, %v726_v33  ;;  %v728_v48 = vadd.f32 %v1815_v13, %v678_v14  ;;  %v805_v41 = vadd.f32 %v804_v43, %v803_v62  ;;  %v844_v49 = vadd.f32 %v843_v37, %v842_v42 }
  0x8a   : > { %v1645_v27 = vadd.f32 %v1816_v53, %v756_v20  ;;  %v806_v12 = vsel %vm794_vm0, %v1626_v11, 0.0  ;;  %v832_v47 = vmul.f32 %v1604_v2, %v1604_v2  ;;  %v845_v32 = vsel %vm794_vm0, %v830_v56, 0.0 }
  0x8b   : > { %v759_v21 = vadd.f32 %v1817_v30, %v727_v52  ;;  %v729_v60 = vadd.f32 %v1818_v35, %v679_v50  ;;  %v807_v18 = vadd.f32 %v806_v12, %v805_v41  ;;  %v846_v61 = vadd.f32 %v845_v32, %v844_v49 }
  0x8c   : > { %v1656_v51 = vadd.f32 %v1819_v58, %v1543_v5  ;;  %v808_v3 = vsel %vm794_vm0, %v1634_v7, 0.0  ;;  %v833_v39 = vmul.f32 %v1612_v1, %v1612_v1  ;;  %v847_v19 = vsel %vm794_vm0, %v831_v4, 0.0 }
  0x8d   : > { %v1664_v59 = vadd.f32 %v1820_v6, %v758_v29  ;;  %v778_v36 = vmul.f32 %v1337_v10, %v696_v9  ;;  %v809_v54 = vadd.f32 %v808_v3, %v807_v18  ;;  %v848_v22 = vadd.f32 %v847_v19, %v846_v61 }
  0x8e   : > { %v760_v63 = vadd.f32 %v1534_v38, %v728_v48  ;;  %v810_v5 = vsel %vm794_vm0, %v1645_v27, 0.0  ;;  %v834_v34 = vmul.f32 %v1626_v11, %v1626_v11  ;;  %v849_v40 = vsel %vm794_vm0, %v832_v47, 0.0 }
  0x8f   : > { %v779_v24 = vmul.f32 %v1337_v10, %v697_v16  ;;  %v1675_v33 = vadd.f32 %v1537_v46, %v759_v21  ;;  %v811_v14 = vadd.f32 %v810_v5, %v809_v54  ;;  %v850_v23 = vadd.f32 %v849_v40, %v848_v22 }
  0x90   : > { %v761_v9 = vadd.f32 %v747_v25, %v729_v60  ;;  %v812_v15 = vsel %vm794_vm0, %v1656_v51, 0.0  ;;  %v835_v38 = vmul.f32 %v1634_v7, %v1634_v7  ;;  %v851_v31 = vsel %vm794_vm0, %v833_v39, 0.0 }
  0x91   : > { %v813_v20 = vadd.f32 %v812_v15, %v811_v14  ;;  %v852_v26 = vadd.f32 %v851_v31, %v850_v23  ;;  %v1682_v44 = vadd.f32 %v778_v36, %v760_v63  ;;  %v814_v10 = vsel %vm794_vm0, %v1664_v59, 0.0  ;;  %v879_v31 = vld [vmem:[%s371_s26] sm:$0x1] }
  0x92   : > { %v836_v46 = vmul.f32 %v1645_v27, %v1645_v27  ;;  %v853_v25 = vsel %vm794_vm0, %v834_v34, 0.0  ;;  %v1689_v52 = vadd.f32 %v779_v24, %v761_v9  ;;  %v816_v57 = vsel %vm794_vm0, %v1675_v33, 0.0 }
  0x93   : > { %v815_v56 = vadd.f32 %v814_v10, %v813_v20  ;;  %v854_v0 = vadd.f32 %v853_v25, %v852_v26  ;;  %v837_v50 = vmul.f32 %v1656_v51, %v1656_v51  ;;  %v855_v62 = vsel %vm794_vm0, %v835_v38, 0.0  ;;  %v883_v10 = vld [vmem:[%s374_s29] sm:$0x1]  ;;  %v1821_v25 = vld [vmem:[#allocation6_spill] sm:$0xff] }
  0x94   : > { %v818_v42 = vsel %vm794_vm0, %v1682_v44, 0.0  ;;  %v838_v37 = vmul.f32 %v1664_v59, %v1664_v59  ;;  %v857_v45 = vsel %vm794_vm0, %v836_v46, 0.0  ;;  %v820_v48 = vsel %vm794_vm0, %v1689_v52, 0.0 }
  0x95   : > { %v817_v43 = vadd.f32 %v816_v57, %v815_v56  ;;  %v856_v4 = vadd.f32 %v855_v62, %v854_v0  ;;  %v839_v41 = vmul.f32 %v1675_v33, %v1675_v33  ;;  %v859_v49 = vsel %vm794_vm0, %v837_v50, 0.0 }
  0x96   : > { %v840_v47 = vmul.f32 %v1682_v44, %v1682_v44  ;;  %v861_v32 = vsel %vm794_vm0, %v838_v37, 0.0  ;;  %v841_v35 = vmul.f32 %v1689_v52, %v1689_v52 }
  0x97   : > { %v819_v29 = vadd.f32 %v818_v42, %v817_v43  ;;  %v858_v13 = vadd.f32 %v857_v45, %v856_v4  ;;  %v863_v60 = vsel %vm794_vm0, %v839_v41, 0.0 }
  0x98   : > { %v865_v16 = vsel %vm794_vm0, %v840_v47, 0.0  ;;  %v867_v39 = vsel %vm794_vm0, %v841_v35, 0.0 }
  0x99   : > { %v821_v53 = vadd.f32 %v820_v48, %v819_v29  ;;  %v860_v12 = vadd.f32 %v859_v49, %v858_v13 }
  0x9b   : > { %v822_v30 = vrot.slane %v821_v53, 4  ;;  %v862_v21 = vadd.f32 %v861_v32, %v860_v12 }
  0x9d   : > { %v823_v18 = vadd.f32 %v822_v30, %v821_v53  ;;  %v864_v61 = vadd.f32 %v863_v60, %v862_v21 }
  0x9f   : > { %v824_v58 = vrot.slane %v823_v18, 2  ;;  %v866_v3 = vadd.f32 %v865_v16, %v864_v61 }
  0xa1   : > { %v825_v19 = vadd.f32 %v824_v58, %v823_v18  ;;  %v868_v6 = vadd.f32 %v867_v39, %v866_v3 }
  0xa3   : > { %v826_v36 = vrot.slane %v825_v19, 1  ;;  %v869_v54 = vrot.slane %v868_v6, 4 }
  0xa5   : > { %v827_v22 = vadd.f32 %v826_v36, %v825_v19  ;;  %v870_v63 = vadd.f32 %v869_v54, %v868_v6 }
  0xa7   : > { %v871_v5 = vrot.slane %v870_v63, 2  ;;  %v875_v40 = vmul.f32 0.010204081, %v827_v22 }
  0xa9   : > { %v872_v34 = vadd.f32 %v871_v5, %v870_v63  ;;  %v877_v23 = vmul.f32 %v875_v40, %v875_v40 }
  0xab   : > { %v873_v24 = vrot.slane %v872_v34, 1 }
  0xad   : > { %v874_v14 = vadd.f32 %v873_v24, %v872_v34 }
  0xaf   : > { %v876_v9 = vmul.f32 0.010204081, %v874_v14 }
  0xb1   : > { %v878_v15 = vsub.f32 %v876_v9, %v877_v23 }
  0xb3   : > { %v880_v38 = vadd.f32 1e-05, %v878_v15 }
  0xb5   : > { %1164 = vrsqrt.f32 %v880_v38 }
  0xbf   : > { %v1165_v20 = vpop.eup %1164 }
  0xc0   : > { %v882_v26 = vmul.f32 %v1165_v20, %v879_v31 }
  0xc2   : > { %v884_v46 = vmul.f32 %v882_v26, %v875_v40  ;;  %v890_v56 = vrot.slane %v882_v26, %v1821_v25 }
  0xc4   : > { %v885_v0 = vsub.f32 %v883_v10, %v884_v46  ;;  %v892_v57 = vmul.f32 %v890_v56, %v1584_v8  ;;  %v893_v50 = vmul.f32 %v890_v56, %v1586_v28  ;;  %v894_v62 = vmul.f32 %v890_v56, %v1588_v55 }
  0xc5   : > { %v895_v43 = vmul.f32 %v890_v56, %v1594_v17  ;;  %v896_v4 = vmul.f32 %v890_v56, %v1604_v2  ;;  %v897_v42 = vmul.f32 %v890_v56, %v1612_v1  ;;  %v898_v37 = vmul.f32 %v890_v56, %v1626_v11 }
  0xc6   : > { %v910_v45 = vrot.slane %v885_v0, %v1821_v25  ;;  %v899_v29 = vmul.f32 %v890_v56, %v1634_v7  ;;  %v900_v13 = vmul.f32 %v890_v56, %v1645_v27  ;;  %v901_v8 = vmul.f32 %v890_v56, %v1656_v51 }
  0xc7   : > { %v902_v28 = vmul.f32 %v890_v56, %v1664_v59  ;;  %v903_v55 = vmul.f32 %v890_v56, %v1675_v33  ;;  %v904_v17 = vmul.f32 %v890_v56, %v1682_v44  ;;  %v905_v2 = vmul.f32 %v890_v56, %v1689_v52 }
  0xc8   : > { %v912_v1 = vadd.f32 %v910_v45, %v892_v57  ;;  %v913_v48 = vadd.f32 %v910_v45, %v893_v50  ;;  %v914_v11 = vadd.f32 %v910_v45, %v894_v62  ;;  %v915_v41 = vadd.f32 %v910_v45, %v895_v43 }
  0xc9   : > { %v916_v49 = vadd.f32 %v910_v45, %v896_v4  ;;  %v917_v53 = vadd.f32 %v910_v45, %v897_v42  ;;  %v918_v12 = vadd.f32 %v910_v45, %v898_v37  ;;  %v919_v7 = vadd.f32 %v910_v45, %v899_v29 }
  0xca   : > { %926 = vst [vmem:[%s1739_s30] sm:$0x7f] %v912_v1  ;;  %927 = vst [vmem:[%s1739_s30 + $0x8] sm:$0x7f] %v913_v48  ;;  %v920_v27 = vadd.f32 %v910_v45, %v900_v13  ;;  %v921_v51 = vadd.f32 %v910_v45, %v901_v8  ;;  %v922_v59 = vadd.f32 %v910_v45, %v902_v28  ;;  %946 = sbr.rel (!%p1251_p5) target bundleno = 217 (0xd9), region = 119 }
  0xcb   : > { %928 = vst [vmem:[%s1739_s30 + $0x10] sm:$0x7f] %v914_v11  ;;  %929 = vst [vmem:[%s1739_s30 + $0x18] sm:$0x7f] %v915_v41  ;;  %v923_v33 = vadd.f32 %v910_v45, %v903_v55  ;;  %v924_v44 = vadd.f32 %v910_v45, %v904_v17  ;;  %v925_v52 = vadd.f32 %v910_v45, %v905_v2 }
  0xcc   : > { %930 = vst [vmem:[%s1739_s30 + $0x20] sm:$0x7f] %v916_v49  ;;  %931 = vst [vmem:[%s1739_s30 + $0x28] sm:$0x7f] %v917_v53 }
  0xcd   : > { %932 = vst [vmem:[%s1739_s30 + $0x30] sm:$0x7f] %v918_v12  ;;  %933 = vst [vmem:[%s1739_s30 + $0x38] sm:$0x7f] %v919_v7 }
  0xce   : > { %934 = vst [vmem:[%s1739_s30 + $0x40] sm:$0x7f] %v920_v27  ;;  %935 = vst [vmem:[%s1739_s30 + $0x48] sm:$0x7f] %v921_v51 }
  0xcf   : > { %936 = vst [vmem:[%s1739_s30 + $0x50] sm:$0x7f] %v922_v59  ;;  %937 = vst [vmem:[%s1739_s30 + $0x58] sm:$0x7f] %v923_v33 }
  0xd0   : > { %938 = vst [vmem:[%s1739_s30 + $0x60] sm:$0x7f] %v924_v44  ;;  %939 = vst [vmem:[%s1739_s30 + $0x68] sm:$0x7f] %v925_v52 }
  0xd1   : > { %v1002_v47 = vld [vmem:[%s1739_s30] sm:$0xff]  ;;  %v1004_v32 = vld [vmem:[%s1739_s30 + $0x8] sm:$0xff] }
  0xd2   : > { %v1006_v30 = vld [vmem:[%s1739_s30 + $0x10] sm:$0xff]  ;;  %v1008_v21 = vld [vmem:[%s1739_s30 + $0x18] sm:$0xff]  ;;  %1003 = vst [vmem:[%s948_s8] sm:$0xff] %v1002_v47  ;;  %1005 = vst [vmem:[%s948_s8 + $0x10] sm:$0xff] %v1004_v32 }
  0xd3   : > { %v1010_v35 = vld [vmem:[%s1739_s30 + $0x20] sm:$0xff]  ;;  %v1012_v60 = vld [vmem:[%s1739_s30 + $0x28] sm:$0xff]  ;;  %1007 = vst [vmem:[%s948_s8 + $0x20] sm:$0xff] %v1006_v30  ;;  %1009 = vst [vmem:[%s948_s8 + $0x30] sm:$0xff] %v1008_v21 }
  0xd4   : > { %1011 = vst [vmem:[%s948_s8 + $0x40] sm:$0xff] %v1010_v35  ;;  %1013 = vst [vmem:[%s948_s8 + $0x50] sm:$0xff] %v1012_v60  ;;  %v1014_v18 = vld [vmem:[%s1739_s30 + $0x30] sm:$0xff]  ;;  %v1016_v61 = vld [vmem:[%s1739_s30 + $0x38] sm:$0xff] }
  0xd5   : > { %v1018_v16 = vld [vmem:[%s1739_s30 + $0x40] sm:$0xff]  ;;  %1015 = vst [vmem:[%s948_s8 + $0x60] sm:$0xff] %v1014_v18  ;;  %1017 = vst [vmem:[%s948_s8 + $0x70] sm:$0xff] %v1016_v61  ;;  %v1020_v58 = vld [vmem:[%s1739_s30 + $0x48] sm:$0xff] }
  0xd6   : > { %1019 = vst [vmem:[%s948_s8 + $0x80] sm:$0xff] %v1018_v16  ;;  %v1022_v3 = vld [vmem:[%s1739_s30 + $0x50] sm:$0xff]  ;;  %v1024_v39 = vld [vmem:[%s1739_s30 + $0x58] sm:$0xff]  ;;  %1021 = vst [vmem:[%s948_s8 + $0x90] sm:$0xff] %v1020_v58 }
  0xd7   : > { %1023 = vst [vmem:[%s948_s8 + $0xa0] sm:$0xff] %v1022_v3  ;;  %1025 = vst [vmem:[%s948_s8 + $0xb0] sm:$0xff] %v1024_v39  ;;  %v1026_v19 = vld [vmem:[%s1739_s30 + $0x60] sm:$0xff]  ;;  %v1028_v6 = vld [vmem:[%s1739_s30 + $0x68] sm:$0xff] }
  0xd8   : > { %1027 = vst [vmem:[%s948_s8 + $0xc0] sm:$0xff] %v1026_v19  ;;  %1029 = vst [vmem:[%s948_s8 + $0xd0] sm:$0xff] %v1028_v6 }
  0xd9 PF: > { %p11_p11 = scmp.ge.s32.totalorder %s1235_s19, 4   ;;  %s1822_s15 = smov %s1184_s16 }
  0xda   : > { %s1823_s16 = smov %s1245_s22  ;;  %s1824_s17 = smov %s1235_s19 }
  0xdb   :  { %13 = sbr.rel (!%p11_p11) target bundleno = 2 (0x2), region = 204 }

</bundles_post_ra>
